<compile_context>
chip_gen: v7x
topology: tpu7x:2x2x1
jax: 0.10.0
libtpu: 0.0.40
codegen_flags: <defaults>
</compile_context>

<pallas_src>
import functools

import jax
import jax.numpy as jnp
from jax.experimental import pallas as pl
from jax.experimental.pallas import tpu as pltpu

ACTION_SIZE = 22
HIDDEN_SIZE = 256
STATE_SIZE = 2 * 11 * 11 + 97  # 339

STATE_PAD = 384        # 339 zero-padded up to 3 * 128 lanes (weights padded once)
HEAD_HALF = 64         # mean -> lanes [0, 64), log_std -> lanes [64, 128)
HEAD_PAD = 2 * HEAD_HALF   # 128: single lane-dense output tile


def _round_up(n, m):
    return ((n + m - 1) // m) * m


def _policy_kernel(x_ref, w1_ref, b1_ref, w2_ref, b2_ref, w3_ref, b3_ref,
                   wh_ref, bh_ref, out_ref, xpad_ref):
    # Stage the raw f32 state tile into a lane-padded VMEM scratch:
    # zero the whole (tm, 384) scratch (aligned store), then overwrite the first
    # 339 lanes with the input tile.  Done every grid step so it stays correct
    # under megacore grid sharding; the extra VMEM store is trivial and hidden
    # under the MXU work.
    xpad_ref[...] = jnp.zeros_like(xpad_ref)
    xpad_ref[:, :STATE_SIZE] = x_ref[...].astype(jnp.float32)

    # bf16 operands into the MXU, f32 accumulation; bias/ReLU/clamp stay on the
    # f32 VPU path; downcast to bf16 only at the K boundary feeding each matmul.
    h = jnp.dot(xpad_ref[...].astype(jnp.bfloat16), w1_ref[...],
                preferred_element_type=jnp.float32)
    h = jnp.maximum(h + b1_ref[...], 0.0)

    h = jnp.dot(h.astype(jnp.bfloat16), w2_ref[...],
                preferred_element_type=jnp.float32)
    h = jnp.maximum(h + b2_ref[...], 0.0)

    h = jnp.dot(h.astype(jnp.bfloat16), w3_ref[...],
                preferred_element_type=jnp.float32)
    h = jnp.maximum(h + b3_ref[...], 0.0)

    # Fused heads: one (HIDDEN, 128) matmul; mean in lanes [0,64), log_std in
    # lanes [64,128). Clamp only the log_std half, then one lane-dense store.
    y = jnp.dot(h.astype(jnp.bfloat16), wh_ref[...],
                preferred_element_type=jnp.float32) + bh_ref[...]
    lane = jax.lax.broadcasted_iota(jnp.int32, y.shape, 1)
    y = jnp.where(lane >= HEAD_HALF, jnp.clip(y, -20.0, 2.0), y)
    out_ref[...] = y.astype(out_ref.dtype)


@functools.partial(jax.jit, static_argnames=("tm", "out_dtype"))
def policy_forward(x, kp, *, tm=512, out_dtype=jnp.float32):
    """x: (B, STATE_SIZE) float32 (or bfloat16). kp: packed params (pack_params)."""
    B = x.shape[0]

    # Balanced batch tiles: minimize dead-row padding for awkward B, keep at
    # least 2 grid steps for B >= 32 so both v7x TensorCores get work.
    n_tiles = max(-(-B // tm), 2 if B >= 32 else 1)
    tm_eff = _round_up(-(-B // n_tiles), 16)
    if tm_eff > B:                       # single small tile: keep block <= array
        tm_eff = (B // 8) * 8 if B >= 8 else B
    grid = (-(-B // tm_eff),)

    def resident(shape):
        # Weight/bias blocks: same block every grid step -> stay VMEM-resident.
        return pl.BlockSpec(shape, lambda i: (0, 0))

    out = pl.pallas_call(
        _policy_kernel,
        out_shape=jax.ShapeDtypeStruct((B, HEAD_PAD), out_dtype),
        grid_spec=pltpu.PrefetchScalarGridSpec(
            num_scalar_prefetch=0,
            grid=grid,
            in_specs=[
                # x tile: full K (= full last dim, legal), no wrapper pad/cast.
                pl.BlockSpec((tm_eff, STATE_SIZE), lambda i: (i, 0)),
                resident((STATE_PAD, HIDDEN_SIZE)),                    # w1
                resident((1, HIDDEN_SIZE)),                            # b1
                resident((HIDDEN_SIZE, HIDDEN_SIZE)),                  # w2
                resident((1, HIDDEN_SIZE)),                            # b2
                resident((HIDDEN_SIZE, HIDDEN_SIZE)),                  # w3
                resident((1, HIDDEN_SIZE)),                            # b3
                resident((HIDDEN_SIZE, HEAD_PAD)),                     # fused head W
                resident((1, HEAD_PAD)),                               # fused head b
            ],
            out_specs=pl.BlockSpec((tm_eff, HEAD_PAD), lambda i: (i, 0)),
            scratch_shapes=[pltpu.VMEM((tm_eff, STATE_PAD), jnp.float32)],
        ),
        compiler_params=pltpu.CompilerParams(
            dimension_semantics=("parallel",),   # megacore shard on v7x
            vmem_limit_bytes=32 << 20,           # a few MiB used even at tm=2048
        ),
    )(x, kp["w1"], kp["b1"], kp["w2"], kp["b2"], kp["w3"], kp["b3"],
      kp["wh"], kp["bh"])

    mean = out[:, :ACTION_SIZE]
    log_std = out[:, HEAD_HALF:HEAD_HALF + ACTION_SIZE]
    return mean, log_std


# ----------------------------- parameter handling -----------------------------

def _xavier_uniform(key, fan_in, fan_out, gain):
    # torch.nn.init.xavier_uniform_ : U(-a, a), a = gain * sqrt(6/(fan_in+fan_out))
    a = gain * jnp.sqrt(6.0 / (fan_in + fan_out))
    # Generate as (out, in) like torch.nn.Linear.weight, then transpose.
    w = jax.random.uniform(key, (fan_out, fan_in), jnp.float32, minval=-a, maxval=a)
    return w.T  # (in, out)


def init_params(key):
    """f32 master parameters, laid out as (in, out) so y = x @ W + b."""
    ks = jax.random.split(key, 5)
    relu_gain = jnp.sqrt(2.0)  # calculate_gain('relu')
    return {
        "w1": _xavier_uniform(ks[0], STATE_SIZE, HIDDEN_SIZE, relu_gain),
        "b1": jnp.zeros((1, HIDDEN_SIZE), jnp.float32),
        "w2": _xavier_uniform(ks[1], HIDDEN_SIZE, HIDDEN_SIZE, relu_gain),
        "b2": jnp.zeros((1, HIDDEN_SIZE), jnp.float32),
        "w3": _xavier_uniform(ks[2], HIDDEN_SIZE, HIDDEN_SIZE, relu_gain),
        "b3": jnp.zeros((1, HIDDEN_SIZE), jnp.float32),
        "wm": _xavier_uniform(ks[3], HIDDEN_SIZE, ACTION_SIZE, 1.0),
        "bm": jnp.zeros((1, ACTION_SIZE), jnp.float32),
        "ws": _xavier_uniform(ks[4], HIDDEN_SIZE, ACTION_SIZE, 1.0),
        "bs": jnp.zeros((1, ACTION_SIZE), jnp.float32),
    }


def pack_params(p):
    """Pack f32 master params into the bf16, lane-padded kernel layout (done once)."""
    w1 = jnp.zeros((STATE_PAD, HIDDEN_SIZE), jnp.bfloat16)
    w1 = w1.at[:STATE_SIZE, :].set(p["w1"].astype(jnp.bfloat16))

    wh = jnp.zeros((HIDDEN_SIZE, HEAD_PAD), jnp.bfloat16)
    wh = wh.at[:, :ACTION_SIZE].set(p["wm"].astype(jnp.bfloat16))
    wh = wh.at[:, HEAD_HALF:HEAD_HALF + ACTION_SIZE].set(p["ws"].astype(jnp.bfloat16))

    bh = jnp.zeros((1, HEAD_PAD), jnp.float32)
    bh = bh.at[:, :ACTION_SIZE].set(p["bm"])
    bh = bh.at[:, HEAD_HALF:HEAD_HALF + ACTION_SIZE].set(p["bs"])

    return {
        "w1": w1, "b1": p["b1"],
        "w2": p["w2"].astype(jnp.bfloat16), "b2": p["b2"],
        "w3": p["w3"].astype(jnp.bfloat16), "b3": p["b3"],
        "wh": wh, "bh": bh,
    }


# --------------------------------- references ---------------------------------

def _reference_forward_bf16(x, p):
    """Same bf16-weight / f32-accumulate math as the kernel, in plain JAX."""
    def mm(a, w):
        return jnp.dot(a.astype(jnp.bfloat16), w.astype(jnp.bfloat16),
                       preferred_element_type=jnp.float32)
    h = jax.nn.relu(mm(x, p["w1"]) + p["b1"])
    h = jax.nn.relu(mm(h, p["w2"]) + p["b2"])
    h = jax.nn.relu(mm(h, p["w3"]) + p["b3"])
    mean = mm(h, p["wm"]) + p["bm"]
    log_std = jnp.clip(mm(h, p["ws"]) + p["bs"], -20.0, 2.0)
    return mean, log_std


def _reference_forward_f32(x, p):
    h = jax.nn.relu(x @ p["w1"] + p["b1"])
    h = jax.nn.relu(h @ p["w2"] + p["b2"])
    h = jax.nn.relu(h @ p["w3"] + p["b3"])
    mean = h @ p["wm"] + p["bm"]
    log_std = jnp.clip(h @ p["ws"] + p["bs"], -20.0, 2.0)
    return mean, log_std


# TODO(synk): PolicyNetwork.sample (Normal rsample / tanh correction) is host-side
# sampling logic, intentionally not implemented as a kernel; only forward() is.

if __name__ == "__main__":
    key = jax.random.PRNGKey(0)
    k_params, k_x = jax.random.split(key)
    master = init_params(k_params)
    kparams = pack_params(master)

    B = 8
    x = jax.random.normal(k_x, (B, STATE_SIZE), jnp.float32)

    mean, log_std = policy_forward(x, kparams)
    jax.block_until_ready((mean, log_std))

    assert mean.shape == (B, ACTION_SIZE) and log_std.shape == (B, ACTION_SIZE)

    # Tight check against a reference that uses the same bf16-weight math.
    mean_ref, log_std_ref = _reference_forward_bf16(x, master)
    assert jnp.allclose(mean, mean_ref, atol=2e-2, rtol=2e-2), \
        float(jnp.max(jnp.abs(mean - mean_ref)))
    assert jnp.allclose(log_std, log_std_ref, atol=2e-2, rtol=2e-2), \
        float(jnp.max(jnp.abs(log_std - log_std_ref)))

    # Loose sanity check against the exact f32 reference (kernel uses bf16 weights).
    mean_f32, log_std_f32 = _reference_forward_f32(x, master)
    assert float(jnp.max(jnp.abs(mean - mean_f32))) < 0.5
    assert float(jnp.max(jnp.abs(log_std - log_std_f32))) < 0.5

    print("KERNEL_OK")
</pallas_src>

<mosaic_0001>
module attributes {stable_mosaic.version = 11 : i64} {
  func.func @_policy_kernel(%arg0: i32, %arg1: memref<8x339xf32, #tpu.memory_space<vmem>>, %arg2: memref<384x256xbf16, #tpu.memory_space<vmem>>, %arg3: memref<1x256xf32, #tpu.memory_space<vmem>>, %arg4: memref<256x256xbf16, #tpu.memory_space<vmem>>, %arg5: memref<1x256xf32, #tpu.memory_space<vmem>>, %arg6: memref<256x256xbf16, #tpu.memory_space<vmem>>, %arg7: memref<1x256xf32, #tpu.memory_space<vmem>>, %arg8: memref<256x128xbf16, #tpu.memory_space<vmem>>, %arg9: memref<1x128xf32, #tpu.memory_space<vmem>>, %arg10: memref<8x128xf32, #tpu.memory_space<vmem>>, %arg11: memref<8x384xf32, #tpu.memory_space<vmem>>) attributes {dimension_semantics = [#tpu.dimension_semantics<parallel>], iteration_bounds = array<i64: 1>, scalar_prefetch = 0 : i64, scratch_operands = 1 : i64, tpu.core_type = #tpu.core_type<tc>, window_params = [{transform_indices = @transform_0, window_bounds = array<i64: 8, 339>}, {pipeline_mode = #tpu.pipeline_mode<synchronous>, transform_indices = @transform_1, window_bounds = array<i64: 384, 256>}, {pipeline_mode = #tpu.pipeline_mode<synchronous>, transform_indices = @transform_2, window_bounds = array<i64: 1, 256>}, {pipeline_mode = #tpu.pipeline_mode<synchronous>, transform_indices = @transform_3, window_bounds = array<i64: 256, 256>}, {pipeline_mode = #tpu.pipeline_mode<synchronous>, transform_indices = @transform_4, window_bounds = array<i64: 1, 256>}, {pipeline_mode = #tpu.pipeline_mode<synchronous>, transform_indices = @transform_5, window_bounds = array<i64: 256, 256>}, {pipeline_mode = #tpu.pipeline_mode<synchronous>, transform_indices = @transform_6, window_bounds = array<i64: 1, 256>}, {pipeline_mode = #tpu.pipeline_mode<synchronous>, transform_indices = @transform_7, window_bounds = array<i64: 256, 128>}, {pipeline_mode = #tpu.pipeline_mode<synchronous>, transform_indices = @transform_8, window_bounds = array<i64: 1, 128>}, {transform_indices = @transform_9, window_bounds = array<i64: 8, 128>}]} {
    %cst = arith.constant 0.000000e+00 : f32
    %0 = vector.broadcast %cst : f32 to vector<8x384xf32>
    %c0 = arith.constant 0 : index
    %c0_0 = arith.constant 0 : index
    %1 = vector.load %arg11[%c0, %c0_0] : memref<8x384xf32, #tpu.memory_space<vmem>>, vector<8x384xf32>
    tpu.vector_store %arg11[%c0, %c0_0], %0 {strides = array<i32>} : memref<8x384xf32, #tpu.memory_space<vmem>>, vector<8x384xf32>,
    %c0_1 = arith.constant 0 : index
    %c0_2 = arith.constant 0 : index
    %2 = vector.load %arg1[%c0_1, %c0_2] : memref<8x339xf32, #tpu.memory_space<vmem>>, vector<8x339xf32>
    %c0_3 = arith.constant 0 : index
    %c0_4 = arith.constant 0 : index
    %3 = vector.load %arg11[%c0_3, %c0_4] : memref<8x384xf32, #tpu.memory_space<vmem>>, vector<8x339xf32>
    tpu.vector_store %arg11[%c0_3, %c0_4], %2 {strides = array<i32>} : memref<8x384xf32, #tpu.memory_space<vmem>>, vector<8x339xf32>,
    %c0_5 = arith.constant 0 : index
    %c0_6 = arith.constant 0 : index
    %4 = vector.load %arg11[%c0_5, %c0_6] : memref<8x384xf32, #tpu.memory_space<vmem>>, vector<8x384xf32>
    %5 = arith.truncf %4 : vector<8x384xf32> to vector<8x384xbf16>
    %c0_7 = arith.constant 0 : index
    %c0_8 = arith.constant 0 : index
    %6 = vector.load %arg2[%c0_7, %c0_8] : memref<384x256xbf16, #tpu.memory_space<vmem>>, vector<384x256xbf16>
    %cst_9 = arith.constant dense<0.000000e+00> : vector<8x256xf32>
    %7 = tpu.matmul %5, %6, %cst_9 {dimension_numbers = #tpu.dot_dimension_numbers<[1], [0], [0], [1], [0, 0, 1, 1], [], []>} : vector<8x384xbf16>, vector<384x256xbf16>, vector<8x256xf32> -> vector<8x256xf32>
    %c0_10 = arith.constant 0 : index
    %c0_11 = arith.constant 0 : index
    %8 = vector.load %arg3[%c0_10, %c0_11] : memref<1x256xf32, #tpu.memory_space<vmem>>, vector<1x256xf32>
    %9 = vector.broadcast %8 : vector<1x256xf32> to vector<8x256xf32>
    %10 = arith.addf %7, %9 : vector<8x256xf32>
    %cst_12 = arith.constant 0.000000e+00 : f32
    %11 = vector.broadcast %cst_12 : f32 to vector<8x256xf32>
    %12 = arith.maximumf %10, %11 : vector<8x256xf32>
    %13 = arith.truncf %12 : vector<8x256xf32> to vector<8x256xbf16>
    %c0_13 = arith.constant 0 : index
    %c0_14 = arith.constant 0 : index
    %14 = vector.load %arg4[%c0_13, %c0_14] : memref<256x256xbf16, #tpu.memory_space<vmem>>, vector<256x256xbf16>
    %cst_15 = arith.constant dense<0.000000e+00> : vector<8x256xf32>
    %15 = tpu.matmul %13, %14, %cst_15 {dimension_numbers = #tpu.dot_dimension_numbers<[1], [0], [0], [1], [0, 0, 1, 1], [], []>} : vector<8x256xbf16>, vector<256x256xbf16>, vector<8x256xf32> -> vector<8x256xf32>
    %c0_16 = arith.constant 0 : index
    %c0_17 = arith.constant 0 : index
    %16 = vector.load %arg5[%c0_16, %c0_17] : memref<1x256xf32, #tpu.memory_space<vmem>>, vector<1x256xf32>
    %17 = vector.broadcast %16 : vector<1x256xf32> to vector<8x256xf32>
    %18 = arith.addf %15, %17 : vector<8x256xf32>
    %cst_18 = arith.constant 0.000000e+00 : f32
    %19 = vector.broadcast %cst_18 : f32 to vector<8x256xf32>
    %20 = arith.maximumf %18, %19 : vector<8x256xf32>
    %21 = arith.truncf %20 : vector<8x256xf32> to vector<8x256xbf16>
    %c0_19 = arith.constant 0 : index
    %c0_20 = arith.constant 0 : index
    %22 = vector.load %arg6[%c0_19, %c0_20] : memref<256x256xbf16, #tpu.memory_space<vmem>>, vector<256x256xbf16>
    %cst_21 = arith.constant dense<0.000000e+00> : vector<8x256xf32>
    %23 = tpu.matmul %21, %22, %cst_21 {dimension_numbers = #tpu.dot_dimension_numbers<[1], [0], [0], [1], [0, 0, 1, 1], [], []>} : vector<8x256xbf16>, vector<256x256xbf16>, vector<8x256xf32> -> vector<8x256xf32>
    %c0_22 = arith.constant 0 : index
    %c0_23 = arith.constant 0 : index
    %24 = vector.load %arg7[%c0_22, %c0_23] : memref<1x256xf32, #tpu.memory_space<vmem>>, vector<1x256xf32>
    %25 = vector.broadcast %24 : vector<1x256xf32> to vector<8x256xf32>
    %26 = arith.addf %23, %25 : vector<8x256xf32>
    %cst_24 = arith.constant 0.000000e+00 : f32
    %27 = vector.broadcast %cst_24 : f32 to vector<8x256xf32>
    %28 = arith.maximumf %26, %27 : vector<8x256xf32>
    %29 = arith.truncf %28 : vector<8x256xf32> to vector<8x256xbf16>
    %c0_25 = arith.constant 0 : index
    %c0_26 = arith.constant 0 : index
    %30 = vector.load %arg8[%c0_25, %c0_26] : memref<256x128xbf16, #tpu.memory_space<vmem>>, vector<256x128xbf16>
    %cst_27 = arith.constant dense<0.000000e+00> : vector<8x128xf32>
    %31 = tpu.matmul %29, %30, %cst_27 {dimension_numbers = #tpu.dot_dimension_numbers<[1], [0], [0], [1], [0, 0, 1, 1], [], []>} : vector<8x256xbf16>, vector<256x128xbf16>, vector<8x128xf32> -> vector<8x128xf32>
    %c0_28 = arith.constant 0 : index
    %c0_29 = arith.constant 0 : index
    %32 = vector.load %arg9[%c0_28, %c0_29] : memref<1x128xf32, #tpu.memory_space<vmem>>, vector<1x128xf32>
    %33 = vector.broadcast %32 : vector<1x128xf32> to vector<8x128xf32>
    %34 = arith.addf %31, %33 : vector<8x128xf32>
    %35 = tpu.iota {dimensions = array<i32: 1>} : vector<8x128xi32>
    %c64_i32 = arith.constant 64 : i32
    %36 = vector.broadcast %c64_i32 : i32 to vector<8x128xi32>
    %37 = arith.cmpi sge, %35, %36 : vector<8x128xi32>
    %cst_30 = arith.constant -2.000000e+01 : f32
    %cst_31 = arith.constant 2.000000e+00 : f32
    %38 = vector.broadcast %cst_30 : f32 to vector<8x128xf32>
    %39 = arith.maximumf %38, %34 : vector<8x128xf32>
    %40 = vector.broadcast %cst_31 : f32 to vector<8x128xf32>
    %41 = arith.minimumf %40, %39 : vector<8x128xf32>
    %42 = arith.select %37, %41, %34 : vector<8x128xi1>, vector<8x128xf32>
    %c0_32 = arith.constant 0 : index
    %c0_33 = arith.constant 0 : index
    %43 = vector.load %arg10[%c0_32, %c0_33] : memref<8x128xf32, #tpu.memory_space<vmem>>, vector<8x128xf32>
    tpu.vector_store %arg10[%c0_32, %c0_33], %42 {strides = array<i32>} : memref<8x128xf32, #tpu.memory_space<vmem>>, vector<8x128xf32>,
    return
  }
  func.func @transform_0(%arg0: i32) -> (i32, i32) {
    %c0_i32 = arith.constant 0 : i32
    %c0_i32_0 = arith.constant 0 : i32
    return %arg0, %c0_i32 : i32, i32
  }
  func.func @transform_1(%arg0: i32) -> (i32, i32) {
    %c0_i32 = arith.constant 0 : i32
    %c0_i32_0 = arith.constant 0 : i32
    %c0_i32_1 = arith.constant 0 : i32
    return %c0_i32, %c0_i32_0 : i32, i32
  }
  func.func @transform_2(%arg0: i32) -> (i32, i32) {
    %c0_i32 = arith.constant 0 : i32
    %c0_i32_0 = arith.constant 0 : i32
    %c0_i32_1 = arith.constant 0 : i32
    return %c0_i32, %c0_i32_0 : i32, i32
  }
  func.func @transform_3(%arg0: i32) -> (i32, i32) {
    %c0_i32 = arith.constant 0 : i32
    %c0_i32_0 = arith.constant 0 : i32
    %c0_i32_1 = arith.constant 0 : i32
    return %c0_i32, %c0_i32_0 : i32, i32
  }
  func.func @transform_4(%arg0: i32) -> (i32, i32) {
    %c0_i32 = arith.constant 0 : i32
    %c0_i32_0 = arith.constant 0 : i32
    %c0_i32_1 = arith.constant 0 : i32
    return %c0_i32, %c0_i32_0 : i32, i32
  }
  func.func @transform_5(%arg0: i32) -> (i32, i32) {
    %c0_i32 = arith.constant 0 : i32
    %c0_i32_0 = arith.constant 0 : i32
    %c0_i32_1 = arith.constant 0 : i32
    return %c0_i32, %c0_i32_0 : i32, i32
  }
  func.func @transform_6(%arg0: i32) -> (i32, i32) {
    %c0_i32 = arith.constant 0 : i32
    %c0_i32_0 = arith.constant 0 : i32
    %c0_i32_1 = arith.constant 0 : i32
    return %c0_i32, %c0_i32_0 : i32, i32
  }
  func.func @transform_7(%arg0: i32) -> (i32, i32) {
    %c0_i32 = arith.constant 0 : i32
    %c0_i32_0 = arith.constant 0 : i32
    %c0_i32_1 = arith.constant 0 : i32
    return %c0_i32, %c0_i32_0 : i32, i32
  }
  func.func @transform_8(%arg0: i32) -> (i32, i32) {
    %c0_i32 = arith.constant 0 : i32
    %c0_i32_0 = arith.constant 0 : i32
    %c0_i32_1 = arith.constant 0 : i32
    return %c0_i32, %c0_i32_0 : i32, i32
  }
  func.func @transform_9(%arg0: i32) -> (i32, i32) {
    %c0_i32 = arith.constant 0 : i32
    %c0_i32_0 = arith.constant 0 : i32
    return %arg0, %c0_i32 : i32, i32
  }
}

</mosaic_0001>

<bundles_post_ra>
// kernel: policy_forward.1
= control target key start
LH: loop header
LB: loop body
LE: loop exit
PB: predicated region body
PF: predicated region fallthrough
CT: control target
= control target key end

     0   :  { %14 = vsyncpa [#allocation4], 0  ;;  %s1817_s0 = inlined_call_operand.hbm [shape: f32[8,339], index: 0, kind: input, shape index: {}]   ;;  %s1818_s1 = inlined_call_operand.hbm [shape: bf16[384,256], index: 1, kind: input, shape index: {}]   ;;  %s1819_s2 = inlined_call_operand.vmem [shape: f32[1,256], index: 2, kind: input, shape index: {}]   ;;  %s1820_s3 = inlined_call_operand.hbm [shape: bf16[256,256], index: 3, kind: input, shape index: {}]   ;;  %s1821_s4 = inlined_call_operand.vmem [shape: f32[1,256], index: 4, kind: input, shape index: {}]   ;;  %s1822_s5 = inlined_call_operand.hbm [shape: bf16[256,256], index: 5, kind: input, shape index: {}]   ;;  %s1823_s6 = inlined_call_operand.vmem [shape: f32[1,256], index: 6, kind: input, shape index: {}]   ;;  %s1824_s7 = inlined_call_operand.hbm [shape: bf16[256,128], index: 7, kind: input, shape index: {}]   ;;  %s1825_s8 = inlined_call_operand.vmem [shape: f32[1,128], index: 8, kind: input, shape index: {}]   ;;  %s1826_s9 = inlined_call_operand.vmem [shape: f32[8,128], index: 9, kind: output, shape index: {}]  }
   0x1   :  { %15 = vsyncpa [#allocation6], 0 }
   0x2   :  { %16 = vsyncpa [#allocation9], 0  ;;  %s1656_s30 = smov [#allocation5]   ;;  %s1540_s13 = scalar_lea.hbm %s1818_s1, 6144 }
   0x3   :  { %s32_s10 = sshll.u32 %s1656_s30, 4  ;;  %p1541_p0 = scmp.ne.s32.totalorder %s1818_s1, %s1540_s13  ;;  %s33_s10 = int_to_ptr.vmem [resolvable:$true] %s32_s10 }
   0x4   :  { %p1544_p1 = scmp.lt.u32.totalorder %s1540_s13, %s1818_s1 }
   0x6   :  { %p1546_p2 = pnand %p1544_p1, %p1541_p0 }
   0x8   :  { %1549 = shalt.err (!%p1546_p2)
}
   0x9   :  { %s1550_s18 = scalar_lea.vmem %s33_s10, 6144  ;;  %p1555_p4 = scmp.lt.s32.totalorder %s33_s10, %s33_s10 }
   0xa   :  { %p1551_p3 = scmp.ne.s32.totalorder %s33_s10, %s1550_s18  ;;  %p1556_p5 = scmp.lt.s32.totalorder %s1550_s18, %s1550_s18 }
   0xc   :  { %p1557_p6 = por %p1556_p5, %p1555_p4 }
   0xe   :  { %p1558_p7 = pnand %p1557_p6, %p1551_p3 }
  0x10   :  { %1561 = shalt.err (!%p1558_p7)
}
  0x11   :  { %s1657_s19 = smov 128   ;;  %s1658_s20 = smov 8  }
  0x12   :  { %38 = dma.hbm_to_vmem [thread:$0]  %s1818_s1, 6144, %s33_s10, [#allocation6], %s1657_s19, %s1657_s19, %s1658_s20  }
  0x13   :  { %s1659_s23 = smov [#allocation8]   ;;  %s1660_s25 = smov [#allocation3]  }
  0x14   :  { %s60_s24 = sshll.u32 %s1659_s23, 4  ;;  %s23_s26 = sshll.u32 %s1660_s25, 4  ;;  %s61_s24 = int_to_ptr.vmem [resolvable:$true] %s60_s24  ;;  %s24_s26 = int_to_ptr.vmem [resolvable:$true] %s23_s26 }
  0x15   :  { %s1562_s29 = scalar_lea.hbm %s1822_s5, 4096 }
  0x16   :  { %p1563_p8 = scmp.ne.s32.totalorder %s1822_s5, %s1562_s29  ;;  %p1566_p9 = scmp.lt.u32.totalorder %s1562_s29, %s1822_s5 }
  0x18   :  { %p1568_p10 = pnand %p1566_p9, %p1563_p8 }
  0x1a   :  { %1571 = shalt.err (!%p1568_p10)
}
  0x1b   :  { %s1572_s1 = scalar_lea.vmem %s61_s24, 4096  ;;  %p1577_p12 = scmp.lt.s32.totalorder %s61_s24, %s61_s24 }
  0x1c   :  { %p1573_p11 = scmp.ne.s32.totalorder %s61_s24, %s1572_s1  ;;  %p1578_p13 = scmp.lt.s32.totalorder %s1572_s1, %s1572_s1 }
  0x1e   :  { %p1579_p0 = por %p1578_p13, %p1577_p12 }
  0x20   :  { %p1580_p1 = pnand %p1579_p0, %p1573_p11 }
  0x22   :  { %1583 = shalt.err (!%p1580_p1)
}
  0x23   :  { %66 = dma.hbm_to_vmem [thread:$0]  %s1822_s5, 4096, %s61_s24, [#allocation9], %s1657_s19, %s1657_s19, %s1658_s20  }
  0x24   :  { %s1584_s17 = scalar_lea.hbm %s1817_s0, 384 }
  0x25   :  { %p1585_p2 = scmp.ne.s32.totalorder %s1817_s0, %s1584_s17  ;;  %p1588_p3 = scmp.lt.u32.totalorder %s1584_s17, %s1817_s0 }
  0x27   :  { %p1590_p4 = pnand %p1588_p3, %p1585_p2 }
  0x29   :  { %1593 = shalt.err (!%p1590_p4)
}
  0x2a   :  { %s1594_s25 = scalar_lea.vmem %s24_s26, 384  ;;  %p1599_p6 = scmp.lt.s32.totalorder %s24_s26, %s24_s26 }
  0x2b   :  { %p1595_p5 = scmp.ne.s32.totalorder %s24_s26, %s1594_s25  ;;  %p1600_p7 = scmp.lt.s32.totalorder %s1594_s25, %s1594_s25 }
  0x2d   :  { %p1601_p8 = por %p1600_p7, %p1599_p6 }
  0x2f   :  { %p1602_p9 = pnand %p1601_p8, %p1595_p5 }
  0x31   :  { %1605 = shalt.err (!%p1602_p9)
}
  0x32   :  { %26 = dma.hbm_to_vmem [thread:$0]  %s1817_s0, 384, %s24_s26, [#allocation4]  }
  0x33   :  { %s1661_s27 = smov [#allocation7]   ;;  %s1662_s29 = smov [#allocation10]  }
  0x34   :  { %s46_s28 = sshll.u32 %s1661_s27, 4  ;;  %s74_s30 = sshll.u32 %s1662_s29, 4  ;;  %s47_s28 = int_to_ptr.vmem [resolvable:$true] %s46_s28  ;;  %s75_s30 = int_to_ptr.vmem [resolvable:$true] %s74_s30 }
  0x35   :  { %s1606_s13 = scalar_lea.hbm %s1820_s3, 4096 }
  0x36   :  { %p1607_p10 = scmp.ne.s32.totalorder %s1820_s3, %s1606_s13  ;;  %p1610_p11 = scmp.lt.u32.totalorder %s1606_s13, %s1820_s3 }
  0x38   :  { %p1612_p12 = pnand %p1610_p11, %p1607_p10 }
  0x3a   :  { %1615 = shalt.err (!%p1612_p12)
}
  0x3b   :  { %s1616_s0 = scalar_lea.vmem %s47_s28, 4096  ;;  %p1621_p0 = scmp.lt.s32.totalorder %s47_s28, %s47_s28 }
  0x3c   :  { %p1617_p13 = scmp.ne.s32.totalorder %s47_s28, %s1616_s0  ;;  %p1622_p1 = scmp.lt.s32.totalorder %s1616_s0, %s1616_s0 }
  0x3e   :  { %p1623_p2 = por %p1622_p1, %p1621_p0 }
  0x40   :  { %p1624_p3 = pnand %p1623_p2, %p1617_p13 }
  0x42   :  { %1627 = shalt.err (!%p1624_p3)
}
  0x43   :  { %52 = dma.hbm_to_vmem [thread:$0]  %s1820_s3, 4096, %s47_s28, [#allocation6], %s1657_s19, %s1657_s19, %s1658_s20  }
  0x44   :  { %s1628_s21 = scalar_lea.hbm %s1824_s7, 2048 }
  0x45   :  { %p1629_p4 = scmp.ne.s32.totalorder %s1824_s7, %s1628_s21  ;;  %p1632_p5 = scmp.lt.u32.totalorder %s1628_s21, %s1824_s7 }
  0x47   :  { %p1634_p6 = pnand %p1632_p5, %p1629_p4 }
  0x49   :  { %1637 = shalt.err (!%p1634_p6)
}
  0x4a   :  { %s1638_s24 = scalar_lea.vmem %s75_s30, 2048  ;;  %p1643_p8 = scmp.lt.s32.totalorder %s75_s30, %s75_s30 }
  0x4b   :  { %p1639_p7 = scmp.ne.s32.totalorder %s75_s30, %s1638_s24  ;;  %p1644_p9 = scmp.lt.s32.totalorder %s1638_s24, %s1638_s24 }
  0x4d   :  { %p1645_p10 = por %p1644_p9, %p1643_p8 }
  0x4f   :  { %p1646_p11 = pnand %p1645_p10, %p1639_p7 }
  0x51   :  { %1649 = shalt.err (!%p1646_p11)
}
  0x52   :  { %s1663_s3 = smov 64   ;;  %s1664_s19 = smov 4  }
  0x53   :  { %80 = dma.hbm_to_vmem [thread:$0]  %s1824_s7, 2048, %s75_s30, [#allocation9], %s1663_s3, %s1663_s3, %s1664_s19  }
  0x54   :  { %1650 = dma.done.wait [#allocation4], 384  }
  0x55   :  { %1651 = vsyncadd [#allocation4], 4294966912 }
  0x56   :  { %1652 = dma.done.wait [#allocation6], 10240  }
  0x57   :  { %1653 = vsyncadd [#allocation6], 4294957056 }
  0x58   :  { %1654 = dma.done.wait [#allocation9], 6144  }
  0x59   :  { %1655 = vsyncadd [#allocation9], 4294961152  ;;  %v1665_v0 = vmov 0.0   ;;  %v1356_v1 = vld [vmem:[#allocation5 + $0x4] ss:$8 sps:$4 sm:$0xff]   ;;  %v103_v14 = vld [vmem:[#allocation3 + $0x8] sm:$0xff] }
  0x5a   :  { %101 = vst [vmem:[#allocation2 + $0x10] sm:$0xff] %v1665_v0  ;;  %v1358_v2 = vld [vmem:[#allocation5] ss:$8 sps:$4 sm:$0xff]   ;;  %415 = vmatprep.subr.bf16.mxu0 %v1356_v1  ;;  %v1359_v3 = vld [vmem:[#allocation5 + $0x14] ss:$8 sps:$4 sm:$0xff]   ;;  %v113_v16 = vpack.c.bf16 %v103_v14, %v103_v14  ;;  %vm107_vm0 = vcmask 678912  }
  0x5b   :  { %416 = vmatpush1.bf16.msra.mxu0 %v1358_v2  ;;  %v1361_v4 = vld [vmem:[#allocation5 + $0x10] ss:$8 sps:$4 sm:$0xff]   ;;  %v1362_v5 = vld [vmem:[#allocation5 + $0x24] ss:$8 sps:$4 sm:$0xff]   ;;  %v1364_v6 = vld [vmem:[#allocation5 + $0x20] ss:$8 sps:$4 sm:$0xff]  }
  0x5c   :  { %417 = vmatprep.subr.bf16.mxu0 %v1359_v3  ;;  %v1365_v7 = vld [vmem:[#allocation5 + $0x34] ss:$8 sps:$4 sm:$0xff]   ;;  %v1367_v8 = vld [vmem:[#allocation5 + $0x30] ss:$8 sps:$4 sm:$0xff]   ;;  %v1368_v9 = vld [vmem:[#allocation5 + $0x44] ss:$8 sps:$4 sm:$0xff]   ;;  %447 = vmatprep.mubr.bf16.mxu0 %v113_v16 }
  0x5d   :  { %v1370_v10 = vld [vmem:[#allocation5 + $0x40] ss:$8 sps:$4 sm:$0xff]   ;;  %v1371_v11 = vld [vmem:[#allocation5 + $0x54] ss:$8 sps:$4 sm:$0xff]   ;;  %v1373_v12 = vld [vmem:[#allocation5 + $0x50] ss:$8 sps:$4 sm:$0xff]  }
  0x5e   :  { %v1374_v13 = vld [vmem:[#allocation5 + $0x64] ss:$8 sps:$4 sm:$0xff]   ;;  %v1376_v15 = vld [vmem:[#allocation5 + $0x60] ss:$8 sps:$4 sm:$0xff]   ;;  %v1377_v18 = vld [vmem:[#allocation5 + $0x74] ss:$8 sps:$4 sm:$0xff]  }
  0x5f   :  { %418 = vmatpush1.bf16.msra.mxu0 %v1361_v4  ;;  %v1786_v17 = vld [vmem:[#allocation3] sm:$0xff]  ;;  %v1379_v19 = vld [vmem:[#allocation5 + $0x70] ss:$8 sps:$4 sm:$0xff]   ;;  %v1383_v22 = vld [vmem:[#allocation5 + $0x94] ss:$8 sps:$4 sm:$0xff]   ;;  %v1666_v63 = vmov 0  }
  0x60   :  { %419 = vmatprep.subr.bf16.mxu0 %v1362_v5  ;;  %v1380_v20 = vld [vmem:[#allocation5 + $0x84] ss:$8 sps:$4 sm:$0xff]   ;;  %v1382_v21 = vld [vmem:[#allocation5 + $0x80] ss:$8 sps:$4 sm:$0xff]   ;;  %v104_v23 = vld [vmem:[#allocation3 + $0x10] sm:$0xff]  ;;  %v112_v56 = vpack.c.bf16 %v1786_v17, %v1786_v17 }
  0x61   :  { %108 = vst.msk [vmem:[#allocation2 + $0x10] sm:$0xff] %vm107_vm0, %v104_v23  ;;  %v1428_v24 = vld [vmem:[#allocation7 + $0x4] ss:$8 sps:$4 sm:$0xff]   ;;  %v1430_v25 = vld [vmem:[#allocation7] ss:$8 sps:$4 sm:$0xff]  }
  0x62   :  { %v1385_v26 = vld [vmem:[#allocation5 + $0x90] ss:$8 sps:$4 sm:$0xff]   ;;  %705 = vmatprep.subr.bf16.mxu1 %v1428_v24  ;;  %v1431_v27 = vld [vmem:[#allocation7 + $0x14] ss:$8 sps:$4 sm:$0xff]   ;;  %v1386_v28 = vld [vmem:[#allocation5 + $0xa4] ss:$8 sps:$4 sm:$0xff]  }
  0x63   :  { %420 = vmatpush1.bf16.msra.mxu0 %v1364_v6  ;;  %706 = vmatpush1.bf16.msra.mxu1 %v1430_v25  ;;  %v1433_v29 = vld [vmem:[#allocation7 + $0x10] ss:$8 sps:$4 sm:$0xff]   ;;  %v1434_v30 = vld [vmem:[#allocation7 + $0x24] ss:$8 sps:$4 sm:$0xff]   ;;  %v1388_v31 = vld [vmem:[#allocation5 + $0xa0] ss:$8 sps:$4 sm:$0xff]  }
  0x64   :  { %421 = vmatprep.subr.bf16.mxu0 %v1365_v7  ;;  %707 = vmatprep.subr.bf16.mxu1 %v1431_v27  ;;  %v1389_v32 = vld [vmem:[#allocation5 + $0xb4] ss:$8 sps:$4 sm:$0xff]   ;;  %v1436_v33 = vld [vmem:[#allocation7 + $0x20] ss:$8 sps:$4 sm:$0xff]   ;;  %v1391_v35 = vld [vmem:[#allocation5 + $0xb0] ss:$8 sps:$4 sm:$0xff]  }
  0x65   :  { %v1437_v34 = vld [vmem:[#allocation7 + $0x34] ss:$8 sps:$4 sm:$0xff]   ;;  %v1392_v36 = vld [vmem:[#allocation5 + $0xc4] ss:$8 sps:$4 sm:$0xff]   ;;  %v1439_v37 = vld [vmem:[#allocation7 + $0x30] ss:$8 sps:$4 sm:$0xff]  }
  0x66   :  { %v1440_v38 = vld [vmem:[#allocation7 + $0x44] ss:$8 sps:$4 sm:$0xff]   ;;  %v1394_v39 = vld [vmem:[#allocation5 + $0xc0] ss:$8 sps:$4 sm:$0xff]   ;;  %v1395_v40 = vld [vmem:[#allocation5 + $0xd4] ss:$8 sps:$4 sm:$0xff]  }
  0x67   :  { %422 = vmatpush1.bf16.msra.mxu0 %v1367_v8  ;;  %708 = vmatpush1.bf16.msra.mxu1 %v1433_v29  ;;  %v1442_v41 = vld [vmem:[#allocation7 + $0x40] ss:$8 sps:$4 sm:$0xff]   ;;  %v1443_v42 = vld [vmem:[#allocation7 + $0x54] ss:$8 sps:$4 sm:$0xff]   ;;  %v1397_v43 = vld [vmem:[#allocation5 + $0xd0] ss:$8 sps:$4 sm:$0xff]  }
  0x68   :  { %423 = vmatprep.subr.bf16.mxu0 %v1368_v9  ;;  %709 = vmatprep.subr.bf16.mxu1 %v1434_v30  ;;  %v1398_v44 = vld [vmem:[#allocation5 + $0xe4] ss:$8 sps:$4 sm:$0xff]   ;;  %v1445_v45 = vld [vmem:[#allocation7 + $0x50] ss:$8 sps:$4 sm:$0xff]   ;;  %v1400_v47 = vld [vmem:[#allocation5 + $0xe0] ss:$8 sps:$4 sm:$0xff]  }
  0x69   :  { %v1446_v46 = vld [vmem:[#allocation7 + $0x64] ss:$8 sps:$4 sm:$0xff]   ;;  %v1401_v48 = vld [vmem:[#allocation5 + $0xf4] ss:$8 sps:$4 sm:$0xff]   ;;  %v1448_v49 = vld [vmem:[#allocation7 + $0x60] ss:$8 sps:$4 sm:$0xff]  }
  0x6a   :  { %v1449_v50 = vld [vmem:[#allocation7 + $0x74] ss:$8 sps:$4 sm:$0xff]   ;;  %v1403_v51 = vld [vmem:[#allocation5 + $0xf0] ss:$8 sps:$4 sm:$0xff]   ;;  %v1406_v52 = vld [vmem:[#allocation5 + $0x104] ss:$8 sps:$4 sm:$0xff]  }
  0x6b   :  { %424 = vmatpush1.bf16.msra.mxu0 %v1370_v10  ;;  %710 = vmatpush1.bf16.msra.mxu1 %v1436_v33  ;;  %v1451_v53 = vld [vmem:[#allocation7 + $0x70] ss:$8 sps:$4 sm:$0xff]   ;;  %v1452_v54 = vld [vmem:[#allocation7 + $0x84] ss:$8 sps:$4 sm:$0xff]   ;;  %v1404_v55 = vld [vmem:[#allocation5 + $0x100] ss:$8 sps:$4 sm:$0xff]  }
  0x6c   :  { %425 = vmatprep.subr.bf16.mxu0 %v1371_v11  ;;  %711 = vmatprep.subr.bf16.mxu1 %v1437_v34  ;;  %v1409_v57 = vld [vmem:[#allocation5 + $0x114] ss:$8 sps:$4 sm:$0xff]   ;;  %v1454_v58 = vld [vmem:[#allocation7 + $0x80] ss:$8 sps:$4 sm:$0xff]   ;;  %v1407_v60 = vld [vmem:[#allocation5 + $0x110] ss:$8 sps:$4 sm:$0xff]  }
  0x6d   :  { %v1455_v59 = vld [vmem:[#allocation7 + $0x94] ss:$8 sps:$4 sm:$0xff]   ;;  %v1412_v61 = vld [vmem:[#allocation5 + $0x124] ss:$8 sps:$4 sm:$0xff]   ;;  %v1457_v62 = vld [vmem:[#allocation7 + $0x90] ss:$8 sps:$4 sm:$0xff]  }
  0x6e   :  { %v1458_v0 = vld [vmem:[#allocation7 + $0xa4] ss:$8 sps:$4 sm:$0xff]   ;;  %v1410_v1 = vld [vmem:[#allocation5 + $0x120] ss:$8 sps:$4 sm:$0xff]   ;;  %v1415_v2 = vld [vmem:[#allocation5 + $0x134] ss:$8 sps:$4 sm:$0xff]  }
  0x6f   :  { %426 = vmatpush1.bf16.msra.mxu0 %v1373_v12  ;;  %712 = vmatpush1.bf16.msra.mxu1 %v1439_v37  ;;  %v1460_v3 = vld [vmem:[#allocation7 + $0xa0] ss:$8 sps:$4 sm:$0xff]   ;;  %v1461_v4 = vld [vmem:[#allocation7 + $0xb4] ss:$8 sps:$4 sm:$0xff]   ;;  %v1413_v5 = vld [vmem:[#allocation5 + $0x130] ss:$8 sps:$4 sm:$0xff]  }
  0x70   :  { %427 = vmatprep.subr.bf16.mxu0 %v1374_v13  ;;  %713 = vmatprep.subr.bf16.mxu1 %v1440_v38  ;;  %v1418_v6 = vld [vmem:[#allocation5 + $0x144] ss:$8 sps:$4 sm:$0xff]   ;;  %v1463_v7 = vld [vmem:[#allocation7 + $0xb0] ss:$8 sps:$4 sm:$0xff]   ;;  %v1416_v9 = vld [vmem:[#allocation5 + $0x140] ss:$8 sps:$4 sm:$0xff]  }
  0x71   :  { %v1464_v8 = vld [vmem:[#allocation7 + $0xc4] ss:$8 sps:$4 sm:$0xff]   ;;  %v1421_v10 = vld [vmem:[#allocation5 + $0x154] ss:$8 sps:$4 sm:$0xff]   ;;  %v1466_v11 = vld [vmem:[#allocation7 + $0xc0] ss:$8 sps:$4 sm:$0xff]  }
  0x72   :  { %v1467_v12 = vld [vmem:[#allocation7 + $0xd4] ss:$8 sps:$4 sm:$0xff]   ;;  %v1419_v13 = vld [vmem:[#allocation5 + $0x150] ss:$8 sps:$4 sm:$0xff]   ;;  %v1424_v14 = vld [vmem:[#allocation5 + $0x164] ss:$8 sps:$4 sm:$0xff]  }
  0x73   :  { %428 = vmatpush1.bf16.msra.mxu0 %v1376_v15  ;;  %714 = vmatpush1.bf16.msra.mxu1 %v1442_v41  ;;  %v1469_v15 = vld [vmem:[#allocation7 + $0xd0] ss:$8 sps:$4 sm:$0xff]   ;;  %v1422_v16 = vld [vmem:[#allocation5 + $0x160] ss:$8 sps:$4 sm:$0xff]   ;;  %v1427_v17 = vld [vmem:[#allocation5 + $0x174] ss:$8 sps:$4 sm:$0xff]  }
  0x74   :  { %429 = vmatprep.subr.bf16.mxu0 %v1377_v18  ;;  %715 = vmatprep.subr.bf16.mxu1 %v1443_v42  ;;  %v1425_v18 = vld [vmem:[#allocation5 + $0x170] ss:$8 sps:$4 sm:$0xff]   ;;  %v1473_v23 = vld [vmem:[#allocation7 + $0xf4] ss:$8 sps:$4 sm:$0xff]   ;;  %v1478_v25 = vld [vmem:[#allocation8 + $0x4] ss:$8 sps:$4 sm:$0xff]  }
  0x75   :  { %v1475_v24 = vld [vmem:[#allocation7 + $0xf0] ss:$8 sps:$4 sm:$0xff]   ;;  %v1476_v42 = vld [vmem:[#allocation8] ss:$8 sps:$4 sm:$0xff]  }
  0x76   :  { %v163_v29 = vld [vmem:[%s1819_s2] sm:$0x3] }
  0x77   :  { %430 = vmatpush1.bf16.msra.mxu0 %v1379_v19  ;;  %716 = vmatpush1.bf16.msra.mxu1 %v1445_v45  ;;  %v111_v19 = vld [vmem:[#allocation2 + $0x10] sm:$0xff]  ;;  %v1479_v45 = vld [vmem:[#allocation8 + $0x10] ss:$8 sps:$4 sm:$0xff]  }
  0x78   :  { %431 = vmatprep.subr.bf16.mxu0 %v1380_v20  ;;  %717 = vmatprep.subr.bf16.mxu1 %v1446_v46  ;;  %v114_v20 = vpack.c.bf16 %v111_v19, %v111_v19  ;;  %v1484_v46 = vld [vmem:[#allocation8 + $0x24] ss:$8 sps:$4 sm:$0xff]  }
  0x79   :  { %v1533_v19 = vld [vmem:[#allocation10 + $0x20] sm:$0xff]  }
  0x7b   :  { %432 = vmatpush1.bf16.msra.mxu0 %v1382_v21  ;;  %718 = vmatpush1.bf16.msra.mxu1 %v1448_v49  ;;  %v1470_v21 = vld [vmem:[#allocation7 + $0xe4] ss:$8 sps:$4 sm:$0xff]   ;;  %v1485_v49 = vld [vmem:[#allocation8 + $0x30] ss:$8 sps:$4 sm:$0xff]  }
  0x7c   :  { %433 = vmatprep.subr.bf16.mxu0 %v1383_v22  ;;  %719 = vmatprep.subr.bf16.mxu1 %v1449_v50  ;;  %v1472_v22 = vld [vmem:[#allocation7 + $0xe0] ss:$8 sps:$4 sm:$0xff]   ;;  %v1490_v50 = vld [vmem:[#allocation8 + $0x44] ss:$8 sps:$4 sm:$0xff]  }
  0x7f   :  { %434 = vmatpush1.bf16.msra.mxu0 %v1385_v26  ;;  %720 = vmatpush1.bf16.msra.mxu1 %v1451_v53  ;;  %v165_v26 = vlaneseq  ;;  %v1491_v53 = vld [vmem:[#allocation8 + $0x50] ss:$8 sps:$4 sm:$0xff]  }
  0x80   :  { %435 = vmatprep.subr.bf16.mxu0 %v1386_v28  ;;  %721 = vmatprep.subr.bf16.mxu1 %v1452_v54  ;;  %v1496_v54 = vld [vmem:[#allocation8 + $0x64] ss:$8 sps:$4 sm:$0xff]  }
  0x81   :  { %v166_v27 = vshrl.u32 %v165_v26, 7 }
  0x83   :  { %436 = vmatpush1.bf16.msra.mxu0 %v1388_v31  ;;  %722 = vmatpush1.bf16.msra.mxu1 %v1454_v58  ;;  %v1791_v28 = vsub.s32 0, %v166_v27  ;;  %v1796_v30 = vsub.s32 1, %v166_v27  ;;  %v1502_v58 = vld [vmem:[#allocation8 + $0x84] ss:$8 sps:$4 sm:$0xff]  }
  0x84   :  { %437 = vmatprep.subr.bf16.mxu0 %v1389_v32  ;;  %723 = vmatprep.subr.bf16.mxu1 %v1455_v59  ;;  %v1500_v59 = vld [vmem:[#allocation8 + $0x80] ss:$8 sps:$4 sm:$0xff]  }
  0x85   :  { %v168_v31 = vrot.slane %v163_v29, %v1791_v28  ;;  %v172_v32 = vrot.slane %v163_v29, %v1796_v30 }
  0x87   :  { %438 = vmatpush1.bf16.msra.mxu0 %v1391_v35  ;;  %724 = vmatpush1.bf16.msra.mxu1 %v1457_v62  ;;  %v1508_v62 = vld [vmem:[#allocation8 + $0xa4] ss:$8 sps:$4 sm:$0xff]  }
  0x88   :  { %439 = vmatprep.subr.bf16.mxu0 %v1392_v36  ;;  %725 = vmatprep.subr.bf16.mxu1 %v1458_v0  ;;  %v1511_v0 = vld [vmem:[#allocation8 + $0xb4] ss:$8 sps:$4 sm:$0xff]  }
  0x8b   :  { %440 = vmatpush1.bf16.msra.mxu0 %v1394_v39  ;;  %726 = vmatpush1.bf16.msra.mxu1 %v1460_v3  ;;  %v1512_v3 = vld [vmem:[#allocation8 + $0xc0] ss:$8 sps:$4 sm:$0xff]  }
  0x8c   :  { %441 = vmatprep.subr.bf16.mxu0 %v1395_v40  ;;  %727 = vmatprep.subr.bf16.mxu1 %v1461_v4  ;;  %v1517_v4 = vld [vmem:[#allocation8 + $0xd4] ss:$8 sps:$4 sm:$0xff]  }
  0x8f   :  { %442 = vmatpush1.bf16.msra.mxu0 %v1397_v43  ;;  %728 = vmatpush1.bf16.msra.mxu1 %v1463_v7  ;;  %v1518_v7 = vld [vmem:[#allocation8 + $0xe0] ss:$8 sps:$4 sm:$0xff]  }
  0x90   :  { %443 = vmatprep.subr.bf16.mxu0 %v1398_v44  ;;  %729 = vmatprep.subr.bf16.mxu1 %v1464_v8  ;;  %v1481_v44 = vld [vmem:[#allocation8 + $0x14] ss:$8 sps:$4 sm:$0xff]  }
  0x91   :  { %v1523_v8 = vld [vmem:[#allocation8 + $0xf4] ss:$8 sps:$4 sm:$0xff]  }
  0x93   :  { %444 = vmatpush1.bf16.msra.mxu0 %v1400_v47  ;;  %730 = vmatpush1.bf16.msra.mxu1 %v1466_v11  ;;  %v1482_v47 = vld [vmem:[#allocation8 + $0x20] ss:$8 sps:$4 sm:$0xff]  }
  0x94   :  { %445 = vmatprep.subr.bf16.mxu0 %v1401_v48  ;;  %731 = vmatprep.subr.bf16.mxu1 %v1467_v12  ;;  %v1487_v48 = vld [vmem:[#allocation8 + $0x34] ss:$8 sps:$4 sm:$0xff]   ;;  %v1525_v11 = vld [vmem:[#allocation10] sm:$0xff]   ;;  %v1526_v12 = vld [vmem:[#allocation10 + $0x48] sm:$0xff]  }
  0x97   :  { %446 = vmatpush1.bf16.msra.mxu0 %v1403_v51  ;;  %732 = vmatpush1.bf16.msra.mxu1 %v1469_v15  ;;  %v1488_v51 = vld [vmem:[#allocation8 + $0x40] ss:$8 sps:$4 sm:$0xff]   ;;  %v1529_v15 = vld [vmem:[#allocation10 + $0x10] sm:$0xff]  }
  0x98   :  { %456 = vmatprep.subr.bf16.mxu0 %v1406_v52  ;;  %733 = vmatprep.subr.bf16.mxu1 %v1470_v21  ;;  %v1493_v52 = vld [vmem:[#allocation8 + $0x54] ss:$8 sps:$4 sm:$0xff]   ;;  %v1535_v21 = vld [vmem:[#allocation10 + $0x28] sm:$0xff]  }
  0x9a   :  { %448 = vmatmul.mubr.bf16.vlgmr.msra.gmra.mrb[0].mxu0 %v112_v56  ;;  %v1499_v56 = vld [vmem:[#allocation8 + $0x74] ss:$8 sps:$4 sm:$0xff]  }
  0x9b   :  { %457 = vmatpush1.bf16.msra.mxu0 %v1404_v55  ;;  %488 = vmatprep.mubr.bf16.mxu0 %v1666_v63  ;;  %v1494_v55 = vld [vmem:[#allocation8 + $0x60] ss:$8 sps:$4 sm:$0xff]  }
  0x9c   :  { %458 = vmatprep.subr.bf16.mxu0 %v1409_v57  ;;  %734 = vmatpush1.bf16.msra.mxu1 %v1472_v22  ;;  %v1497_v57 = vld [vmem:[#allocation8 + $0x70] ss:$8 sps:$4 sm:$0xff]   ;;  %v1506_v63 = vld [vmem:[#allocation8 + $0xa0] ss:$8 sps:$4 sm:$0xff]  }
  0x9d   :  { %735 = vmatprep.subr.bf16.mxu1 %v1473_v23  ;;  %v533_v22 = vld [vmem:[%s1821_s4] sm:$0x3] }
  0x9e   :  { %v538_v23 = vrot.slane %v533_v22, %v1791_v28 }
  0x9f   :  { %459 = vmatpush1.bf16.msra.mxu0 %v1407_v60  ;;  %v1505_v60 = vld [vmem:[#allocation8 + $0x94] ss:$8 sps:$4 sm:$0xff]  }
  0xa0   :  { %460 = vmatprep.subr.bf16.mxu0 %v1412_v61  ;;  %736 = vmatpush1.bf16.msra.mxu1 %v1475_v24  ;;  %v1503_v61 = vld [vmem:[#allocation8 + $0x90] ss:$8 sps:$4 sm:$0xff]   ;;  %v542_v24 = vrot.slane %v533_v22, %v1796_v30 }
  0xa1   :  { %954 = vmatprep.subr.bf16.mxu1 %v1478_v25 }
  0xa3   :  { %461 = vmatpush1.bf16.msra.mxu0 %v1410_v1  ;;  %v1509_v1 = vld [vmem:[#allocation8 + $0xb0] ss:$8 sps:$4 sm:$0xff]  }
  0xa4   :  { %462 = vmatprep.subr.bf16.mxu0 %v1415_v2  ;;  %v1514_v2 = vld [vmem:[#allocation8 + $0xc4] ss:$8 sps:$4 sm:$0xff]  }
  0xa7   :  { %463 = vmatpush1.bf16.msra.mxu0 %v1413_v5  ;;  %v1515_v5 = vld [vmem:[#allocation8 + $0xd0] ss:$8 sps:$4 sm:$0xff]  }
  0xa8   :  { %464 = vmatprep.subr.bf16.mxu0 %v1418_v6  ;;  %v1520_v6 = vld [vmem:[#allocation8 + $0xe4] ss:$8 sps:$4 sm:$0xff]  }
  0xab   :  { %465 = vmatpush1.bf16.msra.mxu0 %v1416_v9  ;;  %v1521_v9 = vld [vmem:[#allocation8 + $0xf0] ss:$8 sps:$4 sm:$0xff]  }
  0xac   :  { %466 = vmatprep.subr.bf16.mxu0 %v1421_v10  ;;  %v1524_v10 = vld [vmem:[#allocation10 + $0x40] sm:$0xff]  }
  0xaf   :  { %467 = vmatpush1.bf16.msra.mxu0 %v1419_v13  ;;  %v1527_v13 = vld [vmem:[#allocation10 + $0x8] sm:$0xff]  }
  0xb0   :  { %468 = vmatprep.subr.bf16.mxu0 %v1424_v14  ;;  %v1528_v14 = vld [vmem:[#allocation10 + $0x50] sm:$0xff]  }
  0xb3   :  { %469 = vmatpush1.bf16.msra.mxu0 %v1422_v16  ;;  %v1530_v16 = vld [vmem:[#allocation10 + $0x58] sm:$0xff]  }
  0xb4   :  { %470 = vmatprep.subr.bf16.mxu0 %v1427_v17  ;;  %v1531_v17 = vld [vmem:[#allocation10 + $0x18] sm:$0xff]  }
  0xb7   :  { %471 = vmatpush1.bf16.msra.mxu0 %v1425_v18  ;;  %v1532_v18 = vld [vmem:[#allocation10 + $0x60] sm:$0xff]  }
  0xb8   :  { %1317 = vmatprep.subr.bf16.mxu0 %v1524_v10 }
  0xba   :  { %489 = vmatmul.mubr.bf16.vlgmr.msra.gmra.mrb[0].mxu0 %v114_v20  ;;  %v1534_v20 = vld [vmem:[#allocation10 + $0x68] sm:$0xff]  }
  0xbb   :  { %1318 = vmatpush3.bf16.msra.mxu0 %v1525_v11 }
  0xbc   :  { %1319 = vmatprep.subr.bf16.mxu0 %v1526_v12 }
  0xbf   :  { %1320 = vmatpush3.bf16.msra.mxu0 %v1527_v13 }
  0xc0   :  { %1321 = vmatprep.subr.bf16.mxu0 %v1528_v14 }
  0xc3   :  { %1322 = vmatpush3.bf16.msra.mxu0 %v1529_v15 }
  0xc4   :  { %1323 = vmatprep.subr.bf16.mxu0 %v1530_v16 }
  0xc7   :  { %1324 = vmatpush3.bf16.msra.mxu0 %v1531_v17 }
  0xc8   :  { %1325 = vmatprep.subr.bf16.mxu0 %v1532_v18 }
  0xcb   :  { %1326 = vmatpush3.bf16.msra.mxu0 %v1533_v19 }
  0xcc   :  { %1327 = vmatprep.subr.bf16.mxu0 %v1534_v20 }
  0xcf   :  { %1328 = vmatpush3.bf16.msra.mxu0 %v1535_v21 }
 0x18d   :  { %v490_v33 = vpop.f32.mrb[0].mxu0 }
 0x18e   :  { %v1339_v34 = vadd.f32 %v490_v33, %v168_v31  ;;  %v492_v35 = vpop.f32.mrb[1].mxu0 }
 0x18f   :  { %v1340_v36 = vadd.f32 %v492_v35, %v172_v32  ;;  %v494_v37 = vpop.f32.mrb[2].mxu0 }
 0x190   :  { %v497_v38 = vmax.f32 %v1339_v34, 0.0  ;;  %v495_v39 = vpop.f32.mrb[3].mxu0 }
 0x191   :  { %v498_v40 = vmax.f32 %v1340_v36, 0.0  ;;  %v1537_v39 = vld [vmem:[#allocation10 + $0x30] sm:$0xff]  }
 0x192   :  { %v499_v43 = vpack.c.bf16 %v497_v38, %v497_v38  ;;  %v1536_v38 = vld [vmem:[#allocation10 + $0x70] sm:$0xff]  }
 0x193   :  { %v500_v41 = vpack.c.bf16 %v498_v40, %v498_v40  ;;  %1329 = vmatprep.subr.bf16.mxu0 %v1536_v38  ;;  %v1538_v40 = vld [vmem:[#allocation10 + $0x78] sm:$0xff]  }
 0x194   :  { %1330 = vmatpush3.bf16.msra.mxu0 %v1537_v39 }
 0x195   :  { %737 = vmatprep.mubr.bf16.mxu1 %v500_v41  ;;  %v1539_v41 = vld [vmem:[#allocation10 + $0x38] sm:$0xff]   ;;  %1331 = vmatprep.subr.bf16.mxu0 %v1538_v40 }
 0x196   :  { %738 = vmatmul.mubr.bf16.vlgmr.msra.gmra.mrb[0].mxu1 %v499_v43 }
 0x197   :  { %955 = vmatpush1.bf16.msra.mxu1 %v1476_v42  ;;  %v782_v42 = vld [vmem:[%s1823_s6] sm:$0x3] }
 0x198   :  { %956 = vmatprep.subr.bf16.mxu1 %v1481_v44  ;;  %1332 = vmatpush3.bf16.msra.mxu0 %v1539_v41  ;;  %v787_v43 = vrot.slane %v782_v42, %v1791_v28  ;;  %v791_v44 = vrot.slane %v782_v42, %v1796_v30 }
 0x19b   :  { %957 = vmatpush1.bf16.msra.mxu1 %v1479_v45 }
 0x19c   :  { %958 = vmatprep.subr.bf16.mxu1 %v1484_v46 }
 0x19f   :  { %959 = vmatpush1.bf16.msra.mxu1 %v1482_v47 }
 0x1a0   :  { %960 = vmatprep.subr.bf16.mxu1 %v1487_v48 }
 0x1a3   :  { %961 = vmatpush1.bf16.msra.mxu1 %v1485_v49 }
 0x1a4   :  { %962 = vmatprep.subr.bf16.mxu1 %v1490_v50 }
 0x1a7   :  { %963 = vmatpush1.bf16.msra.mxu1 %v1488_v51 }
 0x1a8   :  { %964 = vmatprep.subr.bf16.mxu1 %v1493_v52 }
 0x1ab   :  { %965 = vmatpush1.bf16.msra.mxu1 %v1491_v53 }
 0x1ac   :  { %966 = vmatprep.subr.bf16.mxu1 %v1496_v54 }
 0x1af   :  { %967 = vmatpush1.bf16.msra.mxu1 %v1494_v55 }
 0x1b0   :  { %968 = vmatprep.subr.bf16.mxu1 %v1499_v56  ;;  %v1300_v56 = vld [vmem:[%s1825_s8] ss:$0 sm:$0xff] }
 0x1b3   :  { %969 = vmatpush1.bf16.msra.mxu1 %v1497_v57 }
 0x1b4   :  { %970 = vmatprep.subr.bf16.mxu1 %v1502_v58  ;;  %v1175_v58 = vand.u32 127, %v165_v26 }
 0x1b6   :  { %vm1176_vm1 = vcmp.ge.s32.totalorder %v1175_v58, 64 }
 0x1b7   :  { %971 = vmatpush1.bf16.msra.mxu1 %v1500_v59 }
 0x1b8   :  { %972 = vmatprep.subr.bf16.mxu1 %v1505_v60 }
 0x1bb   :  { %973 = vmatpush1.bf16.msra.mxu1 %v1503_v61 }
 0x1bc   :  { %974 = vmatprep.subr.bf16.mxu1 %v1508_v62 }
 0x1bf   :  { %975 = vmatpush1.bf16.msra.mxu1 %v1506_v63 }
 0x1c0   :  { %976 = vmatprep.subr.bf16.mxu1 %v1511_v0 }
 0x1c3   :  { %977 = vmatpush1.bf16.msra.mxu1 %v1509_v1 }
 0x1c4   :  { %978 = vmatprep.subr.bf16.mxu1 %v1514_v2 }
 0x1c7   :  { %979 = vmatpush1.bf16.msra.mxu1 %v1512_v3 }
 0x1c8   :  { %980 = vmatprep.subr.bf16.mxu1 %v1517_v4 }
 0x1cb   :  { %981 = vmatpush1.bf16.msra.mxu1 %v1515_v5 }
 0x1cc   :  { %982 = vmatprep.subr.bf16.mxu1 %v1520_v6 }
 0x1cf   :  { %983 = vmatpush1.bf16.msra.mxu1 %v1518_v7 }
 0x1d0   :  { %984 = vmatprep.subr.bf16.mxu1 %v1523_v8 }
 0x1d3   :  { %985 = vmatpush1.bf16.msra.mxu1 %v1521_v9 }
 0x269   :  { %v739_v25 = vpop.f32.mrb[0].mxu1 }
 0x26a   :  { %v740_v27 = vadd.f32 %v739_v25, %v538_v23  ;;  %v741_v29 = vpop.f32.mrb[1].mxu1 }
 0x26b   :  { %v742_v31 = vadd.f32 %v741_v29, %v542_v24  ;;  %v743_v32 = vpop.f32.mrb[2].mxu1 }
 0x26c   :  { %v746_v33 = vmax.f32 %v740_v27, 0.0  ;;  %v744_v34 = vpop.f32.mrb[3].mxu1 }
 0x26d   :  { %v747_v35 = vmax.f32 %v742_v31, 0.0 }
 0x26e   :  { %v748_v37 = vpack.c.bf16 %v746_v33, %v746_v33 }
 0x26f   :  { %v749_v36 = vpack.c.bf16 %v747_v35, %v747_v35 }
 0x271   :  { %986 = vmatprep.mubr.bf16.mxu1 %v749_v36 }
 0x272   :  { %987 = vmatmul.mubr.bf16.vlgmr.msra.gmra.mrb[4].mxu1 %v748_v37 }
 0x345   :  { %v988_v45 = vpop.f32.mrb[4].mxu1 }
 0x346   :  { %v989_v46 = vadd.f32 %v988_v45, %v787_v43  ;;  %v990_v47 = vpop.f32.mrb[5].mxu1 }
 0x347   :  { %v991_v48 = vadd.f32 %v990_v47, %v791_v44  ;;  %v992_v49 = vpop.f32.mrb[6].mxu1 }
 0x348   :  { %v995_v50 = vmax.f32 %v989_v46, 0.0  ;;  %v993_v51 = vpop.f32.mrb[7].mxu1 }
 0x349   :  { %v996_v52 = vmax.f32 %v991_v48, 0.0 }
 0x34a   :  { %v997_v54 = vpack.c.bf16 %v995_v50, %v995_v50 }
 0x34b   :  { %v998_v53 = vpack.c.bf16 %v996_v52, %v996_v52 }
 0x34d   :  { %1166 = vmatprep.mubr.bf16.mxu0 %v998_v53 }
 0x34e   :  { %1167 = vmatmul.mubr.bf16.vlgmr.msra.gmra.mrb[4].mxu0 %v997_v54 }
 0x421   :  { %v1333_v55 = vpop.f32.mrb[4].mxu0 }
 0x422   :  { %v1334_v28 = vpop.f32.mrb[5].mxu0 }
 0x423   :  { %v1335_v57 = vadd.f32 %v1334_v28, %v1333_v55  ;;  %v1336_v30 = vpop.f32.mrb[6].mxu0 }
 0x424   :  { %v1337_v59 = vpop.f32.mrb[7].mxu0 }
 0x425   :  { %v1169_v60 = vadd.f32 %v1335_v57, %v1300_v56 }
 0x427   :  { %v1177_v61 = vmax.f32 %v1169_v60, -20.0 }
 0x429   :  { %v1178_v62 = vmin.f32 %v1177_v61, 2.0 }
 0x42b   :  { %v1179_v63 = vsel %vm1176_vm1, %v1178_v62, %v1169_v60 }
 0x42c   :  { %1180 = vst [vmem:[%s1826_s9] sm:$0xff] %v1179_v63 }
 0x42d   :  { %1185 = vsyncpa [#allocation4], 1 }
 0x42e   :  { %1186 = vsyncpa [#allocation6], 1 }
 0x42f   :  { %1187 = vsyncpa [#allocation9], 1 }

</bundles_post_ra>
